<compile_context>
chip_gen: v7x
topology: tpu7x:2x2x1
jax: 0.10.0
libtpu: 0.0.40
codegen_flags: <defaults>
</compile_context>

<pallas_src>
import functools

import jax
import jax.numpy as jnp
from jax.experimental import pallas as pl
from jax.experimental.pallas import tpu as pltpu


def _focal_partial_kernel(logits_ref, target_ref, psum_ref, *, n_rows, tile_n):
    """One batch tile: partial sum of per-row cross-entropy NLL."""
    x = logits_ref[...].astype(jnp.float32)                        # (tile_n, C)
    tn, c = x.shape

    # Numerically stable log-softmax denominator per row (lane reduction, XLU).
    row_max = jnp.max(x, axis=-1, keepdims=True)                   # (tile_n, 1)
    lse = row_max + jnp.log(
        jnp.sum(jnp.exp(x - row_max), axis=-1, keepdims=True))     # (tile_n, 1)

    # Target-class logit via a one-hot lane mask (vectorized; stays on VPU/XLU slots).
    # NOTE: out-of-range target ids silently contribute tgt_logit = 0 (PyTorch would error).
    cls_ids = jax.lax.broadcasted_iota(jnp.int32, (tn, c), 1)      # (tile_n, C)
    tgt = target_ref[...]                                          # (tile_n, 1) int32
    tgt_logit = jnp.sum(jnp.where(cls_ids == tgt, x, 0.0),
                        axis=-1, keepdims=True)                    # (tile_n, 1)

    nll = lse - tgt_logit                                          # (tile_n, 1)

    # Mask rows past the true batch size (ragged last tile reads undefined padding).
    row_ids = (pl.program_id(0) * tile_n
               + jax.lax.broadcasted_iota(jnp.int32, (tn, 1), 0))
    nll = jnp.where(row_ids < n_rows, nll, 0.0)

    psum_ref[...] = jnp.sum(nll).reshape(1, 1, 1)


def _choose_tile_rows(n, c, itemsize, tile_rows=None, target_bytes=2 * 1024 * 1024):
    """Pick a row-tile: ~2 MiB of logits per block, multiple of 8 rows (or full N)."""
    if tile_rows is not None:
        rows = max(8, (int(tile_rows) + 7) // 8 * 8)
    else:
        rows = target_bytes // max(1, c * itemsize)
        rows = max(8, (int(rows) // 8) * 8)
    if rows >= n:
        return n                      # single full block (second-to-last dim == N is legal)
    return rows


def focal_loss(logits, target, *, gamma=0.0, eps=1e-07, tile_rows=None):
    """logits: (N, C) float; target: (N,) int class indices. Returns scalar f32."""
    # NOTE: `eps` is unused in the reference forward pass as well.
    del eps
    n, c = logits.shape
    target2d = target.astype(jnp.int32).reshape(n, 1)

    itemsize = jnp.dtype(logits.dtype).itemsize
    tile_n = _choose_tile_rows(n, c, itemsize, tile_rows)
    num_tiles = pl.cdiv(n, tile_n)

    block_bytes = tile_n * c * itemsize
    # Double-buffered inputs + f32 working set + headroom; capped at 32 MiB so the same
    # setting is safe on v5e / v6e / v7x (v7x has only 64 MiB physical VMEM per TC).
    vmem_limit = int(min(32 * 1024 * 1024,
                         max(8 * 1024 * 1024, 6 * block_bytes + (2 << 20))))

    partial = pl.pallas_call(
        functools.partial(_focal_partial_kernel, n_rows=n, tile_n=tile_n),
        out_shape=jax.ShapeDtypeStruct((num_tiles, 1, 1), jnp.float32),
        grid=(num_tiles,),
        in_specs=[
            pl.BlockSpec((tile_n, c), lambda i: (i, 0)),   # native dtype; cast in-kernel
            pl.BlockSpec((tile_n, 1), lambda i: (i, 0)),
        ],
        out_specs=pl.BlockSpec((1, 1, 1), lambda i: (i, 0, 0)),
        compiler_params=pltpu.CompilerParams(
            dimension_semantics=("parallel",),
            vmem_limit_bytes=vmem_limit,
        ),
    )(logits, target2d)

    # Finalization: O(num_tiles) scalar math -> free in the wrapper (per perf review).
    logp = jnp.sum(partial) / jnp.float32(n)
    p = jnp.exp(-logp)
    base = jnp.maximum(jnp.float32(1.0) - p, 0.0)  # p can round slightly > 1 when logp ~ 0
    g = float(gamma)
    if g == 0.0:
        mod = jnp.float32(1.0)
    elif g == float(int(g)) and 0.0 < g <= 8.0:
        mod = base
        for _ in range(int(g) - 1):
            mod = mod * base
    else:
        mod = jnp.power(base, jnp.float32(g))
    return (mod * logp).astype(jnp.float32)


def _focal_loss_ref(logits, target, *, gamma=0.0):
    # Pure-JAX reference for a sanity check.
    x = logits.astype(jnp.float32)
    logz = jax.nn.logsumexp(x, axis=-1)
    tgt_logit = jnp.take_along_axis(x, target[:, None], axis=-1)[:, 0]
    logp = jnp.mean(logz - tgt_logit)
    p = jnp.exp(-logp)
    return (1.0 - p) ** gamma * logp


if __name__ == "__main__":
    key = jax.random.PRNGKey(0)
    k1, k2 = jax.random.split(key)

    N, C = 20, 32  # small batch with a ragged tail when tiled at 8 rows
    logits = jax.random.normal(k1, (N, C), dtype=jnp.float32)
    target = jax.random.randint(k2, (N,), 0, C, dtype=jnp.int32)

    gamma = 2.0  # repo default is 0; use 2 to exercise the focal modulation

    ref = _focal_loss_ref(logits, target, gamma=gamma)

    # Default path (auto tile = full batch here).
    out = jax.block_until_ready(focal_loss(logits, target, gamma=gamma))
    assert jnp.allclose(out, ref, rtol=1e-5, atol=1e-6), (out, ref)

    # Forced multi-tile path: 3 grid steps, ragged last tile (exercises masking + parallel grid).
    out_tiled = jax.block_until_ready(focal_loss(logits, target, gamma=gamma, tile_rows=8))
    assert jnp.allclose(out_tiled, ref, rtol=1e-5, atol=1e-6), (out_tiled, ref)

    print("KERNEL_OK")
</pallas_src>

<mosaic_0001>
module attributes {stable_mosaic.version = 11 : i64} {
  func.func @_focal_partial_kernel(%arg0: i32, %arg1: memref<20x32xf32, #tpu.memory_space<vmem>>, %arg2: memref<20x1xi32, #tpu.memory_space<vmem>>, %arg3: memref<1x1x1xf32, #tpu.memory_space<vmem>>) attributes {dimension_semantics = [#tpu.dimension_semantics<parallel>], iteration_bounds = array<i64: 1>, scalar_prefetch = 0 : i64, scratch_operands = 0 : i64, tpu.core_type = #tpu.core_type<tc>, window_params = [{transform_indices = @transform_0, window_bounds = array<i64: 20, 32>}, {transform_indices = @transform_1, window_bounds = array<i64: 20, 1>}, {transform_indices = @transform_2, window_bounds = array<i64: 1, 1, 1>}]} {
    %c0 = arith.constant 0 : index
    %c0_0 = arith.constant 0 : index
    %0 = vector.load %arg1[%c0, %c0_0] : memref<20x32xf32, #tpu.memory_space<vmem>>, vector<20x32xf32>
    %cst = arith.constant dense<0xFF800000> : vector<20xf32>
    %1 = vector.multi_reduction <maximumf>, %0, %cst [1] : vector<20x32xf32> to vector<20xf32>
    %2 = vector.shape_cast %1 : vector<20xf32> to vector<20x1xf32>
    %3 = vector.broadcast %2 : vector<20x1xf32> to vector<20x32xf32>
    %4 = arith.subf %0, %3 : vector<20x32xf32>
    %5 = math.exp %4 : vector<20x32xf32>
    %cst_1 = arith.constant dense<0.000000e+00> : vector<20xf32>
    %6 = vector.multi_reduction <add>, %5, %cst_1 [1] : vector<20x32xf32> to vector<20xf32>
    %7 = vector.shape_cast %6 : vector<20xf32> to vector<20x1xf32>
    %8 = math.log %7 : vector<20x1xf32>
    %9 = arith.addf %2, %8 : vector<20x1xf32>
    %10 = tpu.iota {dimensions = array<i32: 1>} : vector<20x32xi32>
    %c0_2 = arith.constant 0 : index
    %c0_3 = arith.constant 0 : index
    %11 = vector.load %arg2[%c0_2, %c0_3] : memref<20x1xi32, #tpu.memory_space<vmem>>, vector<20x1xi32>
    %12 = vector.broadcast %11 : vector<20x1xi32> to vector<20x32xi32>
    %13 = arith.cmpi eq, %10, %12 : vector<20x32xi32>
    %cst_4 = arith.constant 0.000000e+00 : f32
    %14 = vector.broadcast %cst_4 : f32 to vector<20x32xf32>
    %15 = arith.select %13, %0, %14 : vector<20x32xi1>, vector<20x32xf32>
    %cst_5 = arith.constant dense<0.000000e+00> : vector<20xf32>
    %16 = vector.multi_reduction <add>, %15, %cst_5 [1] : vector<20x32xf32> to vector<20xf32>
    %17 = vector.shape_cast %16 : vector<20xf32> to vector<20x1xf32>
    %18 = arith.subf %9, %17 : vector<20x1xf32>
    %c20_i32 = arith.constant 20 : i32
    %19 = arith.muli %arg0, %c20_i32 : i32
    %20 = tpu.iota {dimensions = array<i32: 0>} : vector<20x1xi32>
    %21 = vector.broadcast %19 : i32 to vector<20x1xi32>
    %22 = arith.addi %21, %20 : vector<20x1xi32>
    %c20_i32_6 = arith.constant 20 : i32
    %23 = vector.broadcast %c20_i32_6 : i32 to vector<20x1xi32>
    %24 = arith.cmpi slt, %22, %23 : vector<20x1xi32>
    %cst_7 = arith.constant 0.000000e+00 : f32
    %25 = vector.broadcast %cst_7 : f32 to vector<20x1xf32>
    %26 = arith.select %24, %18, %25 : vector<20x1xi1>, vector<20x1xf32>
    %27 = vector.shape_cast %26 : vector<20x1xf32> to vector<1x20x1xf32>
    %cst_8 = arith.constant dense<0.000000e+00> : vector<1xf32>
    %28 = vector.multi_reduction <add>, %27, %cst_8 [1, 2] : vector<1x20x1xf32> to vector<1xf32>
    %29 = vector.shape_cast %28 : vector<1xf32> to vector<1x1x1xf32>
    %30 = vector.extract %29[0, 0, 0] : f32 from vector<1x1x1xf32>
    %31 = vector.broadcast %30 : f32 to vector<1x1x1xf32>
    %c0_9 = arith.constant 0 : index
    %c0_10 = arith.constant 0 : index
    %c0_11 = arith.constant 0 : index
    %32 = vector.load %arg3[%c0_9, %c0_10, %c0_11] : memref<1x1x1xf32, #tpu.memory_space<vmem>>, vector<1x1x1xf32>
    tpu.vector_store %arg3[%c0_9, %c0_10, %c0_11], %31 {strides = array<i32>} : memref<1x1x1xf32, #tpu.memory_space<vmem>>, vector<1x1x1xf32>,
    return
  }
  func.func @transform_0(%arg0: i32) -> (i32, i32) {
    %c0_i32 = arith.constant 0 : i32
    %c0_i32_0 = arith.constant 0 : i32
    return %arg0, %c0_i32 : i32, i32
  }
  func.func @transform_1(%arg0: i32) -> (i32, i32) {
    %c0_i32 = arith.constant 0 : i32
    %c0_i32_0 = arith.constant 0 : i32
    return %arg0, %c0_i32 : i32, i32
  }
  func.func @transform_2(%arg0: i32) -> (i32, i32, i32) {
    %c0_i32 = arith.constant 0 : i32
    %c0_i32_0 = arith.constant 0 : i32
    %c0_i32_1 = arith.constant 0 : i32
    return %arg0, %c0_i32, %c0_i32_0 : i32, i32, i32
  }
}

</mosaic_0001>

<bundles_post_ra>
// kernel: tpu_custom_call.1
= control target key start
LH: loop header
LB: loop body
LE: loop exit
PB: predicated region body
PF: predicated region fallthrough
CT: control target
= control target key end

     0   :  { %vm15_vm0 = vcmask 261120   ;;  %vm22_vm1 = vcmask 257024   ;;  %s231_s0 = inlined_call_operand.vmem [shape: f32[20,32], index: 0, kind: input, shape index: {}]   ;;  %s232_s1 = inlined_call_operand.vmem [shape: s32[20,1], index: 1, kind: input, shape index: {}]   ;;  %s233_s2 = inlined_call_operand.hbm [shape: f32[1,1,1], index: 2, kind: output, shape index: {}]  }
   0x1   :  { %v12_v0 = vld [vmem:[%s231_s0] sm:$0xff]  ;;  %v14_v1 = vld [vmem:[%s231_s0 + $0x10] sm:$0xf]  ;;  %v13_v2 = vld [vmem:[%s231_s0 + $0x8] sm:$0xff] }
   0x2   :  { %v16_v3 = vsel %vm15_vm0, %v12_v0, -inf  ;;  %v23_v4 = vsel %vm22_vm1, %v14_v1, -inf }
   0x3   :  { %17 = vmax.xlane.f32.xlu0 %v16_v3  ;;  %24 = vmax.xlane.f32.xlu1 %v23_v4 }
   0x4   :  { %7 = vsyncpa [#allocation3], 0  ;;  %v19_v5 = vsel %vm15_vm0, %v13_v2, -inf  ;;  %v175_v6 = vmov 0   ;;  %v55_v7 = vld [vmem:[%s232_s1] sm:$0xff]  ;;  %v56_v9 = vld [vmem:[%s232_s1 + $0x8] sm:$0xff]  ;;  %v53_v19 = vlaneseq }
   0x5   :  { %137 = vset.pattern.permute.xlu1 %v175_v6  ;;  %138 = vset.pattern.permute.xlu0 %v175_v6  ;;  %v57_v8 = vld [vmem:[%s232_s1 + $0x10] sm:$0xf]  ;;  %vm100_vm6 = vcmask 7168   ;;  %vm104_vm7 = vcmask 3072   ;;  %s176_s1 = smov [#allocation2]   ;;  %vm117_vm8 = vcmask 0  }
   0x6   :  { %v54_v20 = vand.u32 127, %v53_v19  ;;  %v87_v41 = vshrl.u32 %v53_v19, 7  ;;  %s125_s20 = sshll.u32 %s176_s1, 4  ;;  %s126_s20 = int_to_ptr.vmem [resolvable:$true] %s125_s20 }
   0x7   :  { %20 = vmax.xlane.f32.xlu0 %v19_v5  ;;  %s151_s22 = scalar_lea.vmem %s126_s20, 16  ;;  %s155_s23 = scalar_lea.vmem %s126_s20, 32 }
   0x8   :  { %v89_v46 = vadd.s32 16, %v87_v41  ;;  %p152_p0 = scmp.ne.s32.totalorder %s126_s20, %s151_s22  ;;  %p156_p1 = scmp.lt.s32.totalorder %s126_s20, %s126_s20 }
   0x9   :  { %p157_p2 = scmp.lt.s32.totalorder %s155_s23, %s151_s22 }
   0xa   :  { %vm96_vm5 = vcmp.lt.s32.totalorder %v89_v46, 20 }
   0xb   :  { %p158_p3 = por %p157_p2, %p156_p1 }
   0xd   :  { %p159_p4 = pnand %p158_p3, %p152_p0 }
  0x14   :  { %59 = vperm.xlu1 %137, %v55_v7  }
  0x18   :  { %65 = vperm.xlu1 %137, %v57_v8  }
  0x1d   :  { %62 = vperm.xlu0 %138, %v56_v9  }
  0x90   :  { %v18_v10 = vpop.xlane.xlu0 %17  ;;  %v25_v11 = vpop.xlane.xlu1 %24 }
  0x91   :  { %v26_v12 = vsub.f32 %v12_v0, %v18_v10  ;;  %v28_v13 = vsub.f32 %v14_v1, %v25_v11 }
  0x93   :  { %v29_v14 = vmul.f32 1.442695, %v26_v12  ;;  %v33_v15 = vmul.f32 1.442695, %v28_v13 }
  0x94   :  { %v21_v16 = vpop.xlane.xlu0 %20  ;;  %v60_v21 = vpop.permute.xlu1 %59 }
  0x95   :  { %139 = vpow2.f32 %v29_v14  ;;  %v27_v17 = vsub.f32 %v13_v2, %v21_v16  ;;  %vm67_vm2 = vcmp.eq.s32.totalorder %v54_v20, %v60_v21 }
  0x96   :  { %141 = vpow2.f32 %v33_v15  ;;  %v70_v28 = vsel %vm67_vm2, %v12_v0, 0.0 }
  0x97   :  { %v31_v18 = vmul.f32 1.442695, %v27_v17  ;;  %v73_v30 = vsel %vm15_vm0, %v70_v28, 0.0 }
  0x98   :  { %v66_v31 = vpop.permute.xlu1 %65 }
  0x99   :  { %143 = vpow2.f32 %v31_v18  ;;  %vm69_vm4 = vcmp.eq.s32.totalorder %v54_v20, %v66_v31 }
  0x9a   :  { %v72_v34 = vsel %vm69_vm4, %v14_v1, 0.0 }
  0x9b   :  { %v79_v35 = vsel %vm22_vm1, %v72_v34, 0.0 }
  0x9c   :  { %v63_v25 = vpop.permute.xlu0 %62 }
  0x9d   :  { %vm68_vm3 = vcmp.eq.s32.totalorder %v54_v20, %v63_v25 }
  0x9e   :  { %v71_v32 = vsel %vm68_vm3, %v13_v2, 0.0 }
  0x9f   :  { %v140_v22 = vpop.eup %139  ;;  %v76_v33 = vsel %vm15_vm0, %v71_v32, 0.0 }
  0xa0   :  { %v142_v23 = vpop.eup %141  ;;  %v35_v24 = vsel %vm15_vm0, %v140_v22, 0.0 }
  0xa1   :  { %36 = vadd.xlane.f32.xlu1 %v35_v24  ;;  %v41_v26 = vsel %vm22_vm1, %v142_v23, 0.0 }
  0xa3   :  { %v144_v27 = vpop.eup %143 }
  0xa4   :  { %v38_v29 = vsel %vm15_vm0, %v144_v27, 0.0 }
  0xa5   :  { %42 = vadd.xlane.f32.xlu1 %v41_v26  ;;  %39 = vadd.xlane.f32.xlu0 %v38_v29 }
  0xa9   :  { %74 = vadd.xlane.f32.xlu1 %v73_v30 }
  0xad   :  { %77 = vadd.xlane.f32.xlu1 %v76_v33 }
  0xb1   :  { %80 = vadd.xlane.f32.xlu1 %v79_v35 }
 0x12e   :  { %v37_v36 = vpop.xlane.xlu1 %36 }
 0x12f   :  { %145 = vlog2.f32 %v37_v36 }
 0x132   :  { %v43_v37 = vpop.xlane.xlu1 %42  ;;  %v40_v38 = vpop.xlane.xlu0 %39 }
 0x133   :  { %147 = vlog2.f32 %v43_v37 }
 0x134   :  { %149 = vlog2.f32 %v40_v38 }
 0x136   :  { %v75_v39 = vpop.xlane.xlu1 %74 }
 0x139   :  { %v146_v40 = vpop.eup %145 }
 0x13a   :  { %v45_v42 = vmul.f32 0.6931472, %v146_v40  ;;  %v78_v43 = vpop.xlane.xlu1 %77 }
 0x13c   :  { %v50_v45 = vadd.f32 %v45_v42, %v18_v10 }
 0x13d   :  { %v148_v44 = vpop.eup %147 }
 0x13e   :  { %v150_v47 = vpop.eup %149  ;;  %v49_v48 = vmul.f32 0.6931472, %v148_v44  ;;  %v82_v51 = vsub.f32 %v50_v45, %v75_v39  ;;  %v81_v53 = vpop.xlane.xlu1 %80 }
 0x13f   :  { %v47_v49 = vmul.f32 0.6931472, %v150_v47 }
 0x140   :  { %v52_v50 = vadd.f32 %v49_v48, %v25_v11  ;;  %v101_v57 = vsel %vm100_vm6, %v82_v51, 0.0 }
 0x141   :  { %v51_v52 = vadd.f32 %v47_v49, %v21_v16 }
 0x142   :  { %v84_v54 = vsub.f32 %v52_v50, %v81_v53 }
 0x143   :  { %v83_v55 = vsub.f32 %v51_v52, %v78_v43 }
 0x144   :  { %v99_v56 = vsel %vm96_vm5, %v84_v54, 0.0 }
 0x145   :  { %v102_v58 = vsel %vm100_vm6, %v83_v55, 0.0  ;;  %v105_v59 = vsel %vm104_vm7, %v99_v56, 0.0 }
 0x146   :  { %v103_v60 = vadd.f32 %v102_v58, %v101_v57 }
 0x148   :  { %v106_v61 = vadd.f32 %v105_v59, %v103_v60 }
 0x14a   :  { %107 = vadd.xlane.f32.xlu1 %v106_v61 }
 0x1d7   :  { %v108_v62 = vpop.xlane.xlu1 %107 }
 0x1d8   :  { %v109_v63 = vrot.slane %v108_v62, 4 }
 0x1da   :  { %v110_v0 = vadd.f32 %v109_v63, %v108_v62 }
 0x1dc   :  { %v111_v1 = vrot.slane %v110_v0, 2 }
 0x1de   :  { %v112_v2 = vadd.f32 %v111_v1, %v110_v0 }
 0x1e0   :  { %v113_v3 = vrot.slane %v112_v2, 1 }
 0x1e2   :  { %v114_v4 = vadd.f32 %v113_v3, %v112_v2 }
 0x1e4   :  { %133 = vpush %v114_v4 }
 0x215   :  { %s134_s21 = spop %133 }
 0x216   :  { %v116_v5 = vstv %s134_s21 }
 0x217   :  { %118 = vst.msk [vmem:[#allocation2] sm:$0x1] %vm117_vm8, %v116_v5 }
 0x218   :  { %162 = shalt.err (!%p159_p4)
}
 0x219   :  { %s163_s26 = scalar_lea.hbm %s233_s2, 16 }
 0x21a   :  { %p164_p5 = scmp.ne.s32.totalorder %s233_s2, %s163_s26  ;;  %p167_p6 = scmp.lt.u32.totalorder %s163_s26, %s233_s2 }
 0x21c   :  { %p169_p7 = pnand %p167_p6, %p164_p5 }
 0x21e   :  { %172 = shalt.err (!%p169_p7)
}
 0x21f   :  { %128 = dma.vmem_to_hbm [thread:$0]  %s126_s20, 16, %s233_s2, [#allocation3]  }
 0x220   :  { %173 = dma.done.wait [#allocation3], 16  }
 0x221   :  { %174 = vsyncadd [#allocation3], 4294967280 }
 0x222   :  { %132 = vsyncpa [#allocation3], 1 }

</bundles_post_ra>
